<compile_context>
chip_gen: v7x
topology: tpu7x:2x2x1
jax: 0.10.0
libtpu: 0.0.40
codegen_flags: <defaults>
</compile_context>

<pallas_src>
import jax
import jax.numpy as jnp
from jax.experimental import pallas as pl
from jax.experimental.pallas import tpu as pltpu

NUM_CLASSES = 10


def _vmem_spec():
    return pl.BlockSpec(memory_space=pltpu.MemorySpace.VMEM)


def alexnet_fused_kernel(pt_ref, wcb_ref, w1r_ref, b1_ref, w2b_ref, o_ref):
    n = o_ref.shape[0]
    blk = n * 64                                    # columns per 2x2 pool-window offset

    # Conv2d(3->4, k=3, s=2, p=1) + bias + ReLU as one transposed im2col matmul:
    # (4, 28) @ (28, 4*n*64); the ones row of pt folds the conv bias into the MXU op.
    y = jnp.dot(wcb_ref[...], pt_ref[...], preferred_element_type=jnp.float32)
    y = jnp.maximum(y, 0.0)                         # (4, 4*n*64), lane-dense

    # MaxPool2d(2): columns ordered (dh, dw, n, ph, pw) -> elementwise max of the four
    # 128-aligned pool-offset column blocks (pure VPU, no relayout).
    pooled = jnp.maximum(
        jnp.maximum(y[:, 0 * blk:1 * blk], y[:, 1 * blk:2 * blk]),
        jnp.maximum(y[:, 2 * blk:3 * blk], y[:, 3 * blk:4 * blk]))      # (4, n*64)

    # Flatten + Linear(256, 32): torch's x.view(N, -1) feature order (oc, ph, pw) is
    # pre-permuted into w1r (4, 64, 32) at pack time, so the "flatten" becomes a batched
    # contraction over (oc, ph*pw) on the (idle) MXU instead of lane slice/concat work.
    pooled_r = pooled.reshape(4, n, 64)             # (oc, n, ph*pw)
    h = jnp.einsum('cnk,ckj->cnj', pooled_r, w1r_ref[...],
                   preferred_element_type=jnp.float32).sum(axis=0)      # (n, 32)
    # Dropout(p=0.5) is identity at inference time.
    # TODO(synk): training-mode dropout (stochastic masking via pltpu.prng_*) not implemented.
    h = jnp.maximum(h + b1_ref[...], 0.0)

    # Linear(32, 10).  The two Linear biases stay as single broadcast adds: folding them
    # would need an in-kernel ones-column concat that costs more than the add it saves.
    w2b = w2b_ref[...]                              # (33, 10) = [w2.T ; b2]
    o = jnp.dot(h, w2b[:32, :], preferred_element_type=jnp.float32) + w2b[32:33, :]
    # TODO(synk): at large batch emit lane-dense logits (pad classes to 128 or store the
    # transposed (10, n) slab) to avoid masked vst partial stores.
    o_ref[...] = o.astype(o_ref.dtype)


def pack_params(params):
    """One-time parameter preprocessing (hoisted out of the per-call forward)."""
    wc, bc, w1, b1, w2, b2 = (params[k] for k in ("wc", "bc", "w1", "b1", "w2", "b2"))
    # Conv weight in im2col row order (kh, kw, ic); conv bias appended as column 27.
    wcb = jnp.concatenate([wc.transpose(0, 2, 3, 1).reshape(4, 27), bc.reshape(4, 1)],
                          axis=1)                                        # (4, 28)
    # Linear(256, 32) weight with torch's (oc, ph, pw) flatten order pre-permuted:
    # w1r[c, k, j] = w1[j, c*64 + k].
    w1r = w1.reshape(32, 4, 64).transpose(1, 2, 0)                       # (4, 64, 32)
    w2b = jnp.concatenate([w2.T, b2.reshape(1, NUM_CLASSES)], axis=0)    # (33, 10)
    return dict(wcb=wcb, w1r=w1r, b1=b1.reshape(1, 32), w2b=w2b)


def alexnet_forward(x_nchw, packed):
    n = x_nchw.shape[0]
    cols_n = 4 * n * 64

    # im2col (trace-time, copy-only ops) in a transposed, pool-friendly layout:
    #   rows    = (kh, kw, ic)        -> 27 (+1 ones row folding the conv bias)
    #   columns = (dh, dw, n, ph, pw) -> 4 * n * 64
    # allow_input_fusion lets XLA fuse this producer chain into the Pallas operand so it
    # is not a separate launch + HBM round trip of the (28, 4n*64) slab.
    xp = jnp.pad(x_nchw, ((0, 0), (0, 0), (1, 1), (1, 1)))               # (n, 3, 34, 34)
    cols = jnp.stack(
        [xp[:, :, kh:kh + 32:2, kw:kw + 32:2] for kh in range(3) for kw in range(3)],
        axis=0)                                                          # (9, n, 3, 16, 16)
    cols = cols.reshape(9, n, 3, 8, 2, 8, 2)                             # (kk, n, ic, ph, dh, pw, dw)
    pt = jnp.transpose(cols, (0, 2, 4, 6, 1, 3, 5)).reshape(27, cols_n)
    pt_aug = jnp.concatenate([pt, jnp.ones((1, cols_n), pt.dtype)], axis=0)   # (28, cols_n)
    # TODO(synk): at large batch, tile the column axis with a ("parallel",) grid in
    # 256-lane multiples (v6e/v7x MXU; 128 on v5e), sized for v7x's 64 MiB VMEM
    # (<=32 MiB scoped), and cast pt/weights to bf16 with f32 accumulation.  At n=2
    # everything fits in VMEM and a grid would only add per-step overhead.

    wcb, w1r, b1, w2b = packed["wcb"], packed["w1r"], packed["b1"], packed["w2b"]

    flops = 2 * 4 * 28 * cols_n + 2 * 4 * n * 64 * 32 + 2 * n * 32 * NUM_CLASSES
    bytes_accessed = 4 * (pt_aug.size + wcb.size + w1r.size + b1.size + w2b.size
                          + n * NUM_CLASSES)

    return pl.pallas_call(
        alexnet_fused_kernel,
        out_shape=jax.ShapeDtypeStruct((n, NUM_CLASSES), jnp.float32),
        in_specs=[_vmem_spec()] * 5,
        out_specs=_vmem_spec(),
        cost_estimate=pl.CostEstimate(flops=flops, transcendentals=0,
                                      bytes_accessed=bytes_accessed),
        compiler_params=pltpu.CompilerParams(
            allow_input_fusion=[True, False, False, False, False]),
    )(pt_aug, wcb, w1r, b1, w2b)


def alexnet_reference(x_nchw, params):
    """Pure-JAX reference matching the PyTorch module (eval mode), HIGHEST precision."""
    wc, bc, w1, b1, w2, b2 = (params[k] for k in ("wc", "bc", "w1", "b1", "w2", "b2"))
    n = x_nchw.shape[0]
    hi = jax.lax.Precision.HIGHEST
    y = jax.lax.conv_general_dilated(
        x_nchw, wc, window_strides=(2, 2), padding=((1, 1), (1, 1)),
        dimension_numbers=("NCHW", "OIHW", "NCHW"), precision=hi)
    y = jnp.maximum(y + bc.reshape(1, 4, 1, 1), 0.0)                     # (n, 4, 16, 16)
    y = y.reshape(n, 4, 8, 2, 8, 2).max(axis=(3, 5))                     # MaxPool2d(2)
    flat = y.reshape(n, 4 * 8 * 8)
    h = jnp.maximum(jnp.dot(flat, w1.T, precision=hi) + b1, 0.0)
    return jnp.dot(h, w2.T, precision=hi) + b2


def init_params(key):
    ks = jax.random.split(key, 6)
    return dict(
        wc=jax.random.normal(ks[0], (4, 3, 3, 3), jnp.float32) * 0.1,   # Conv2d weight (OC,IC,KH,KW)
        bc=jax.random.normal(ks[1], (4,), jnp.float32) * 0.1,           # Conv2d bias
        w1=jax.random.normal(ks[2], (32, 256), jnp.float32) * 0.05,     # Linear(256,32) weight (out,in)
        b1=jax.random.normal(ks[3], (32,), jnp.float32) * 0.05,
        w2=jax.random.normal(ks[4], (NUM_CLASSES, 32), jnp.float32) * 0.05,
        b2=jax.random.normal(ks[5], (NUM_CLASSES,), jnp.float32) * 0.05,
    )


if __name__ == "__main__":
    key = jax.random.PRNGKey(0)
    kx, kp = jax.random.split(key)
    # Input must be (N, 3, 32, 32) so that features() -> (N, 4, 8, 8) = 256 classifier inputs.
    x = jax.random.normal(kx, (2, 3, 32, 32), jnp.float32)
    params = init_params(kp)
    packed = pack_params(params)            # one-time packing, outside the jitted forward

    out = jax.jit(alexnet_forward)(x, packed)
    out = jax.block_until_ready(out)
    assert out.shape == (2, NUM_CLASSES) and out.dtype == jnp.float32

    ref = alexnet_reference(x, params)
    # All-f32 path with f32 MXU accumulation -> tolerance tightened from 2e-2 to 1e-4.
    assert bool(jnp.allclose(out, ref, atol=1e-4, rtol=1e-4)), "kernel/reference mismatch"
    print("KERNEL_OK")
</pallas_src>

<mosaic_0001>
module attributes {stable_mosaic.version = 11 : i64} {
  func.func @alexnet_fused_kernel(%arg0: memref<28x512xf32, #tpu.memory_space<vmem>>, %arg1: memref<4x28xf32, #tpu.memory_space<vmem>>, %arg2: memref<4x64x32xf32, #tpu.memory_space<vmem>>, %arg3: memref<1x32xf32, #tpu.memory_space<vmem>>, %arg4: memref<33x10xf32, #tpu.memory_space<vmem>>, %arg5: memref<2x10xf32, #tpu.memory_space<vmem>>) attributes {dimension_semantics = [], scalar_prefetch = 0 : i64, scratch_operands = 0 : i64, tpu.core_type = #tpu.core_type<tc>} {
    %c0 = arith.constant 0 : index
    %c0_0 = arith.constant 0 : index
    %0 = vector.load %arg1[%c0, %c0_0] : memref<4x28xf32, #tpu.memory_space<vmem>>, vector<4x28xf32>
    %c0_1 = arith.constant 0 : index
    %c0_2 = arith.constant 0 : index
    %1 = vector.load %arg0[%c0_1, %c0_2] : memref<28x512xf32, #tpu.memory_space<vmem>>, vector<28x512xf32>
    %cst = arith.constant dense<0.000000e+00> : vector<4x512xf32>
    %2 = tpu.matmul %0, %1, %cst {dimension_numbers = #tpu.dot_dimension_numbers<[1], [0], [0], [1], [0, 0, 1, 1], [], []>} : vector<4x28xf32>, vector<28x512xf32>, vector<4x512xf32> -> vector<4x512xf32>
    %cst_3 = arith.constant 0.000000e+00 : f32
    %3 = vector.broadcast %cst_3 : f32 to vector<4x512xf32>
    %4 = arith.maximumf %2, %3 : vector<4x512xf32>
    %5 = vector.extract_strided_slice %4 {offsets = [0, 0], sizes = [4, 128], strides = [1, 1]} : vector<4x512xf32> to vector<4x128xf32>
    %6 = vector.extract_strided_slice %4 {offsets = [0, 128], sizes = [4, 128], strides = [1, 1]} : vector<4x512xf32> to vector<4x128xf32>
    %7 = arith.maximumf %5, %6 : vector<4x128xf32>
    %8 = vector.extract_strided_slice %4 {offsets = [0, 256], sizes = [4, 128], strides = [1, 1]} : vector<4x512xf32> to vector<4x128xf32>
    %9 = vector.extract_strided_slice %4 {offsets = [0, 384], sizes = [4, 128], strides = [1, 1]} : vector<4x512xf32> to vector<4x128xf32>
    %10 = arith.maximumf %8, %9 : vector<4x128xf32>
    %11 = arith.maximumf %7, %10 : vector<4x128xf32>
    %12 = vector.shape_cast %11 : vector<4x128xf32> to vector<4x2x64xf32>
    %c0_4 = arith.constant 0 : index
    %c0_5 = arith.constant 0 : index
    %c0_6 = arith.constant 0 : index
    %13 = vector.load %arg2[%c0_4, %c0_5, %c0_6] : memref<4x64x32xf32, #tpu.memory_space<vmem>>, vector<4x64x32xf32>
    "tpu.trace_start"() <{level = 10 : i32, message = "cnk,ckj->cnj"}> : () -> ()
    %cst_7 = arith.constant dense<0.000000e+00> : vector<4x2x32xf32>
    %14 = tpu.matmul %12, %13, %cst_7 {dimension_numbers = #tpu.dot_dimension_numbers<[2], [1], [1], [2], [0, 0, 0, 1, 1, 2], [0], [0]>} : vector<4x2x64xf32>, vector<4x64x32xf32>, vector<4x2x32xf32> -> vector<4x2x32xf32>
    "tpu.trace_stop"() : () -> ()
    %cst_8 = arith.constant dense<0.000000e+00> : vector<2x32xf32>
    %15 = vector.multi_reduction <add>, %14, %cst_8 [0] : vector<4x2x32xf32> to vector<2x32xf32>
    %c0_9 = arith.constant 0 : index
    %c0_10 = arith.constant 0 : index
    %16 = vector.load %arg3[%c0_9, %c0_10] : memref<1x32xf32, #tpu.memory_space<vmem>>, vector<1x32xf32>
    %17 = vector.broadcast %16 : vector<1x32xf32> to vector<2x32xf32>
    %18 = arith.addf %15, %17 : vector<2x32xf32>
    %cst_11 = arith.constant 0.000000e+00 : f32
    %19 = vector.broadcast %cst_11 : f32 to vector<2x32xf32>
    %20 = arith.maximumf %18, %19 : vector<2x32xf32>
    %c0_12 = arith.constant 0 : index
    %c0_13 = arith.constant 0 : index
    %21 = vector.load %arg4[%c0_12, %c0_13] : memref<33x10xf32, #tpu.memory_space<vmem>>, vector<33x10xf32>
    %22 = vector.extract_strided_slice %21 {offsets = [0, 0], sizes = [32, 10], strides = [1, 1]} : vector<33x10xf32> to vector<32x10xf32>
    %cst_14 = arith.constant dense<0.000000e+00> : vector<2x10xf32>
    %23 = tpu.matmul %20, %22, %cst_14 {dimension_numbers = #tpu.dot_dimension_numbers<[1], [0], [0], [1], [0, 0, 1, 1], [], []>} : vector<2x32xf32>, vector<32x10xf32>, vector<2x10xf32> -> vector<2x10xf32>
    %24 = vector.extract_strided_slice %21 {offsets = [32, 0], sizes = [1, 10], strides = [1, 1]} : vector<33x10xf32> to vector<1x10xf32>
    %25 = vector.broadcast %24 : vector<1x10xf32> to vector<2x10xf32>
    %26 = arith.addf %23, %25 : vector<2x10xf32>
    %c0_15 = arith.constant 0 : index
    %c0_16 = arith.constant 0 : index
    %27 = vector.load %arg5[%c0_15, %c0_16] : memref<2x10xf32, #tpu.memory_space<vmem>>, vector<2x10xf32>
    tpu.vector_store %arg5[%c0_15, %c0_16], %26 {strides = array<i32>} : memref<2x10xf32, #tpu.memory_space<vmem>>, vector<2x10xf32>,
    return
  }
}

</mosaic_0001>

<bundles_post_ra>
// kernel: alexnet_forward.2
= control target key start
LH: loop header
LB: loop body
LE: loop exit
PB: predicated region body
PF: predicated region fallthrough
CT: control target
= control target key end

     0   :  { %s1367_s0 = inlined_call_operand.vmem [shape: f32[4,28], index: 0, kind: input, shape index: {}]   ;;  %s1368_s1 = inlined_call_operand.vmem [shape: f32[4,64,32], index: 1, kind: input, shape index: {}]   ;;  %s1369_s2 = inlined_call_operand.vmem [shape: f32[1,32], index: 2, kind: input, shape index: {}]   ;;  %s1370_s3 = inlined_call_operand.vmem [shape: f32[33,10], index: 3, kind: input, shape index: {}]   ;;  %s1371_s4 = inlined_call_operand.vmem [shape: f32[27,512], index: 4, kind: input, shape index: {}]   ;;  %s1372_s5 = inlined_call_operand.<no memory space> [shape: f32[], index: 5, kind: input, shape index: {}]   ;;  %s1373_s6 = inlined_call_operand.hbm [shape: f32[2,10], index: 6, kind: output, shape index: {}]  }
   0x1   :  { %v11_v0 = vstv %s1372_s5 }
   0x2   :  { %v841_v1 = vld [vmem:[%s1371_s4 + $0x8] sm:$0xff]  ;;  %v843_v3 = vld [vmem:[%s1371_s4 + $0x18] sm:$0xff]  ;;  %v143_v4 = vlaneseq  ;;  %v23_v7 = vld [vmem:[%s1371_s4] sm:$0xff]  ;;  %v1103_v9 = vmov 0.0  }
   0x3   :  { %v845_v2 = vld [vmem:[%s1371_s4 + $0x28] sm:$0xff]  ;;  %v847_v6 = vld [vmem:[%s1371_s4 + $0x38] sm:$0xff]  ;;  %v844_v8 = vld [vmem:[%s1371_s4 + $0x20] sm:$0xff]  ;;  %279 = vmatprep.mubr.f32.mxu0 %v1103_v9  ;;  %350 = vmatprep.mubr.f32.mxu1 %v1103_v9 }
   0x4   :  { %v997_v5 = vpack.c.bf16 %v845_v2, %v841_v1  ;;  %v1007_v10 = vpack.c.bf16 %v847_v6, %v843_v3  ;;  %v999_v11 = vpack.c.bf16 %v844_v8, %v23_v7  ;;  %v842_v12 = vld [vmem:[%s1371_s4 + $0x10] sm:$0xff]  ;;  %v849_v14 = vld [vmem:[%s1371_s4 + $0x48] sm:$0xff]  ;;  %v1178_v15 = vshrl.u32 %v143_v4, 7  ;;  %v851_v18 = vld [vmem:[%s1371_s4 + $0x58] sm:$0xff] }
   0x5   :  { %v846_v13 = vld [vmem:[%s1371_s4 + $0x30] sm:$0xff]  ;;  %v853_v17 = vld [vmem:[%s1371_s4 + $0x68] sm:$0xff]  ;;  %v855_v20 = vld [vmem:[%s1371_s4 + $0x78] sm:$0xff] }
   0x6   :  { %998 = vmatprep.subr.bf16.mxu0 %v997_v5  ;;  %v1009_v16 = vpack.c.bf16 %v846_v13, %v842_v12  ;;  %1008 = vmatprep.subr.bf16.mxu1 %v1007_v10  ;;  %v145_v19 = vadd.s32 24, %v1178_v15  ;;  %v848_v21 = vld [vmem:[%s1371_s4 + $0x40] sm:$0xff]  ;;  %v850_v23 = vld [vmem:[%s1371_s4 + $0x50] sm:$0xff] }
   0x7   :  { %1000 = vmatpush1.bf16.msra.mxu0 %v999_v11  ;;  %v852_v22 = vld [vmem:[%s1371_s4 + $0x60] sm:$0xff]  ;;  %v854_v24 = vld [vmem:[%s1371_s4 + $0x70] sm:$0xff] }
   0x8   :  { %1010 = vmatpush1.bf16.msra.mxu1 %v1009_v16  ;;  %vm146_vm0 = vcmp.lt.s32.totalorder %v145_v19, 27 }
   0x9   :  { %12 = vsyncpa [#allocation8], 0  ;;  %v157_v25 = vsel %vm146_vm0, %v853_v17, %v11_v0  ;;  %v177_v26 = vsel %vm146_vm0, %v855_v20, %v11_v0  ;;  %v147_v27 = vsel %vm146_vm0, %v852_v22, %v11_v0  ;;  %v167_v28 = vsel %vm146_vm0, %v854_v24, %v11_v0  ;;  %v181_v37 = vld [vmem:[%s1367_s0] sm:$0xf]  ;;  %v401_v39 = vld [vmem:[%s1368_s1 + $0x8] sm:$0xff]  ;;  %s1107_s11 = smov 64  }
   0xa   :  { %160 = vst [vmem:[#allocation9 + $0x68] sm:$0xff] %v157_v25  ;;  %180 = vst [vmem:[#allocation9 + $0x78] sm:$0xff] %v177_v26  ;;  %vm202_vm1 = vcmask 1043456   ;;  %vm1104_vm2 = vmmov 1   ;;  %vm198_vm4 = vcmask 228352   ;;  %v400_v38 = vld [vmem:[%s1368_s1] sm:$0xff] }
   0xb   :  { %150 = vst [vmem:[#allocation9 + $0x60] sm:$0xff] %v147_v27  ;;  %170 = vst [vmem:[#allocation9 + $0x70] sm:$0xff] %v167_v28  ;;  %v408_v40 = vld [vmem:[%s1368_s1 + $0x40] sm:$0xff]  ;;  %v1105_v41 = vmov 0.0|0.0   ;;  %v1018_v42 = vpack.c.bf16 %v401_v39, %v400_v38  ;;  %v409_v43 = vld [vmem:[%s1368_s1 + $0x48] sm:$0xff]  ;;  %vm1106_vm5 = vmmov 0  }
   0xc   :  { %vm1002_vm3 = vmpackc.low %vm202_vm1, %vm1104_vm2  ;;  %v402_v44 = vld [vmem:[%s1368_s1 + $0x10] sm:$0xff]  ;;  %v403_v45 = vld [vmem:[%s1368_s1 + $0x18] sm:$0xff]  ;;  %v1030_v46 = vpack.c.bf16 %v409_v43, %v408_v40  ;;  %v1108_v11 = vmov 1983009808   ;;  %vm432_vm6 = vcmask 523264   ;;  %vm725_vm7 = vcmask 254976  }
   0xd   :  { %v410_v47 = vld [vmem:[%s1368_s1 + $0x50] sm:$0xff]  ;;  %v411_v48 = vld [vmem:[%s1368_s1 + $0x58] sm:$0xff]  ;;  %v1021_v49 = vpack.c.bf16 %v403_v45, %v402_v44  ;;  %v404_v51 = vld [vmem:[%s1368_s1 + $0x20] sm:$0xff]  ;;  %v368_v12 = vunpack.c.l.s4 %v1108_v11  ;;  %vm751_vm8 = vcmask 261120   ;;  %s1110_s27 = smov [#allocation7]   ;;  %vm825_vm9 = vcmask 74752  }
   0xe   :  { %v1033_v50 = vpack.c.bf16 %v411_v48, %v410_v47  ;;  %v405_v52 = vld [vmem:[%s1368_s1 + $0x28] sm:$0xff]  ;;  %v412_v54 = vld [vmem:[%s1368_s1 + $0x60] sm:$0xff]  ;;  %v406_v57 = vld [vmem:[%s1368_s1 + $0x30] sm:$0xff]  ;;  %s833_s28 = sshll.u32 %s1110_s27, 4  ;;  %s834_s28 = int_to_ptr.vmem [resolvable:$true] %s833_s28 }
   0xf   :  { %v1024_v53 = vpack.c.bf16 %v405_v52, %v404_v51  ;;  %v413_v55 = vld [vmem:[%s1368_s1 + $0x68] sm:$0xff]  ;;  %v407_v58 = vld [vmem:[%s1368_s1 + $0x38] sm:$0xff]  ;;  %v414_v60 = vld [vmem:[%s1368_s1 + $0x70] sm:$0xff]  ;;  %v369_v13 = vunpack.c.0.s8 %v368_v12  ;;  %s1079_s29 = scalar_lea.vmem %s834_s28, 32  ;;  %p1084_p1 = scmp.lt.s32.totalorder %s834_s28, %s834_s28 }
  0x10   :  { %v1036_v56 = vpack.c.bf16 %v413_v55, %v412_v54  ;;  %v1027_v59 = vpack.c.bf16 %v407_v58, %v406_v57  ;;  %v415_v61 = vld [vmem:[%s1368_s1 + $0x78] sm:$0xff]  ;;  %v417_v24 = vld [vmem:[%s1368_s1 + $0x88] sm:$0xff]  ;;  %v424_v26 = vld [vmem:[%s1368_s1 + $0xc0] sm:$0xff]  ;;  %p1080_p0 = scmp.ne.s32.totalorder %s834_s28, %s1079_s29  ;;  %p1085_p2 = scmp.lt.s32.totalorder %s1079_s29, %s1079_s29 }
  0x11   :  { %v195_v29 = vld [vmem:[#allocation9 + $0x68] sm:$0xf]  ;;  %v197_v30 = vld [vmem:[#allocation9 + $0x78] sm:$0xf]  ;;  %v1039_v62 = vpack.c.bf16 %v415_v61, %v414_v60  ;;  %v372_v17 = vsub.s32 %v369_v13, %v1178_v15  ;;  %v428_v39 = vld [vmem:[%s1368_s1 + $0xe0] sm:$0xff] }
  0x12   :  { %v194_v31 = vld [vmem:[#allocation9 + $0x60] sm:$0xf]  ;;  %v1001_v32 = vpack.c.bf16 %v195_v29, %v849_v14  ;;  %v1011_v33 = vpack.c.bf16 %v197_v30, %v851_v18  ;;  %v196_v35 = vld [vmem:[#allocation9 + $0x70] sm:$0xf]  ;;  %v1109_v14 = vmov 1934713408   ;;  %p1086_p3 = por %p1085_p2, %p1084_p1 }
  0x13   :  { %v1004_v34 = vpack.c.bf16 %v194_v31, %v848_v21  ;;  %v1014_v36 = vpack.c.bf16 %v196_v35, %v850_v23  ;;  %v385_v16 = vunpack.c.l.s4 %v1109_v14  ;;  %v416_v23 = vld [vmem:[%s1368_s1 + $0x80] sm:$0xff]  ;;  %v425_v27 = vld [vmem:[%s1368_s1 + $0xc8] sm:$0xff]  ;;  %v418_v29 = vld [vmem:[%s1368_s1 + $0x90] sm:$0xff] }
  0x14   :  { %1003 = vmatprep.subr.msk.bf16.mxu0 %vm1002_vm3, %v1001_v32  ;;  %1013 = vmatprep.subr.msk.bf16.mxu1 %vm1002_vm3, %v1011_v33  ;;  %v1042_v28 = vpack.c.bf16 %v417_v24, %v416_v23  ;;  %v419_v30 = vld [vmem:[%s1368_s1 + $0x98] sm:$0xff]  ;;  %v1054_v31 = vpack.c.bf16 %v425_v27, %v424_v26  ;;  %v426_v33 = vld [vmem:[%s1368_s1 + $0xd0] sm:$0xff]  ;;  %v429_v40 = vld [vmem:[%s1368_s1 + $0xe8] sm:$0xff]  ;;  %p1087_p4 = pnand %p1086_p3, %p1080_p0 }
  0x15   :  { %1006 = vmatpush1.bf16.msk.msra.mxu0 %vm1002_vm3, %v1004_v34  ;;  %1016 = vmatpush1.bf16.msk.msra.mxu1 %vm1002_vm3, %v1014_v36  ;;  %v386_v18 = vunpack.c.0.s8 %v385_v16  ;;  %v427_v34 = vld [vmem:[%s1368_s1 + $0xd8] sm:$0xff]  ;;  %v1045_v35 = vpack.c.bf16 %v419_v30, %v418_v29  ;;  %v420_v36 = vld [vmem:[%s1368_s1 + $0xa0] sm:$0xff]  ;;  %v422_v43 = vld [vmem:[%s1368_s1 + $0xb0] sm:$0xff]  ;;  %v1060_v45 = vpack.c.bf16 %v429_v40, %v428_v39 }
  0x16   :  { %1017 = vmatprep.subr.bf16.mxu0 %v1105_v41  ;;  %1029 = vmatprep.subr.bf16.mxu1 %v1105_v41  ;;  %v1057_v38 = vpack.c.bf16 %v427_v34, %v426_v33  ;;  %v423_v44 = vld [vmem:[%s1368_s1 + $0xb8] sm:$0xff]  ;;  %v430_v47 = vld [vmem:[%s1368_s1 + $0xf0] sm:$0xff]  ;;  %v743_v54 = vld [vmem:[%s1370_s3 + $0x8] sm:$0xff] }
  0x17   :  { %v389_v22 = vsub.s32 %v386_v18, %v1178_v15  ;;  %v431_v48 = vld [vmem:[%s1368_s1 + $0xf8] sm:$0xff]  ;;  %v867_v12 = vld [vmem:[%s1370_s3 + $0x20] ss:$0 sm:$0xff] }
  0x18   :  { %858 = vmatmul.mubr.msk.f32.vlgmr.msra.gmra.mrb[0].mxu0 %vm198_vm4, %v181_v37  ;;  %861 = vmatmul.mubr.msk.f32.vlgmr.msra.gmra.mrb[0].mxu1 %vm198_vm4, %v181_v37  ;;  %v421_v37 = vld [vmem:[%s1368_s1 + $0xa8] sm:$0xff] }
  0x19   :  { %1019 = vmatpush3.bf16.msra.mxu0 %v1018_v42  ;;  %1031 = vmatpush3.bf16.msra.mxu1 %v1030_v46  ;;  %v1048_v42 = vpack.c.bf16 %v421_v37, %v420_v36 }
  0x1a   :  { %1020 = vmatprep.subr.bf16.mxu0 %v1105_v41  ;;  %1032 = vmatprep.subr.bf16.mxu1 %v1105_v41 }
  0x1b   :  { %926 = vmatprep.mubr.msk.f32.mxu0 %vm1106_vm5, %v1103_v9  ;;  %945 = vmatprep.mubr.msk.f32.mxu1 %vm1106_vm5, %v1103_v9 }
  0x1d   :  { %1022 = vmatpush3.bf16.msra.mxu0 %v1021_v49  ;;  %1034 = vmatpush3.bf16.msra.mxu1 %v1033_v50  ;;  %v1051_v49 = vpack.c.bf16 %v423_v44, %v422_v43  ;;  %v1063_v50 = vpack.c.bf16 %v431_v48, %v430_v47 }
  0x1e   :  { %1023 = vmatprep.subr.bf16.mxu0 %v1105_v41  ;;  %1035 = vmatprep.subr.bf16.mxu1 %v1105_v41 }
  0x21   :  { %1025 = vmatpush3.bf16.msra.mxu0 %v1024_v53  ;;  %1037 = vmatpush3.bf16.msra.mxu1 %v1036_v56  ;;  %v742_v53 = vld [vmem:[%s1370_s3] sm:$0xff]  ;;  %v744_v56 = vld [vmem:[%s1370_s3 + $0x10] sm:$0xff] }
  0x22   :  { %1026 = vmatprep.subr.bf16.mxu0 %v1105_v41  ;;  %1038 = vmatprep.subr.bf16.mxu1 %v1105_v41  ;;  %v1066_v55 = vpack.c.bf16 %v743_v54, %v742_v53 }
  0x25   :  { %1028 = vmatpush3.bf16.msra.mxu0 %v1027_v59  ;;  %1040 = vmatpush3.bf16.msra.mxu1 %v1039_v62 }
  0x26   :  { %1041 = vmatprep.subr.bf16.mxu0 %v1105_v41  ;;  %1053 = vmatprep.subr.bf16.mxu1 %v1105_v41 }
  0xeb   :  { %v281_v63 = vpop.f32.mrb[0].mxu0  ;;  %v352_v0 = vpop.f32.mrb[0].mxu1 }
  0xec   :  { %v357_v1 = vmax.f32 %v281_v63, 0.0  ;;  %v359_v2 = vmax.f32 %v352_v0, 0.0  ;;  %v283_v3 = vpop.f32.mrb[1].mxu0  ;;  %v354_v4 = vpop.f32.mrb[1].mxu1 }
  0xed   :  { %v358_v5 = vmax.f32 %v283_v3, 0.0  ;;  %v360_v6 = vmax.f32 %v354_v4, 0.0 }
  0xef   :  { %v361_v7 = vmax.f32 %v357_v1, %v358_v5  ;;  %v362_v8 = vmax.f32 %v359_v2, %v360_v6  ;;  %v866_v6 = vld [vmem:[%s1369_s2] ss:$0 sm:$0xff] }
  0xf1   :  { %v363_v10 = vmax.f32 %v361_v7, %v362_v8 }
  0xf3   :  { %365 = vrot.lane.b32.xlu0 %v363_v10, %s1107_s11  ;;  %v373_v20 = vrot.slane %v363_v10, %v372_v17 }
 0x165   :  { %v366_v19 = vpop.permute.xlu0 %365 }
 0x166   :  { %v381_v21 = vrot.slane %v366_v19, %v372_v17 }
 0x168   :  { %v382_v25 = vcombine.low %v373_v20, %v381_v21  ;;  %v383_v46 = vcombine.high %v373_v20, %v381_v21 }
 0x16a   :  { %v390_v15 = vrot.slane %v382_v25, %v389_v22  ;;  %v397_v51 = vrot.slane %v383_v46, %v389_v22 }
 0x16c   :  { %v398_v32 = vcombine.high %v390_v15, %v1103_v9  ;;  %927 = vmatmul.mubr.msk.f32.vlgmr.msra.gmra.mrb[2].mxu0 %vm432_vm6, %v390_v15  ;;  %v399_v52 = vcombine.high %v397_v51, %v1103_v9 }
 0x16d   :  { %1043 = vmatpush3.bf16.msra.mxu0 %v1042_v28  ;;  %964 = vmatprep.mubr.msk.f32.mxu0 %vm1106_vm5, %v1103_v9 }
 0x16e   :  { %946 = vmatmul.mubr.msk.f32.vlgmr.msra.gmra.mrb[2].mxu1 %vm432_vm6, %v398_v32  ;;  %1044 = vmatprep.subr.bf16.mxu0 %v1105_v41 }
 0x16f   :  { %1055 = vmatpush3.bf16.msra.mxu1 %v1054_v31  ;;  %983 = vmatprep.mubr.msk.f32.mxu1 %vm1106_vm5, %v1103_v9 }
 0x170   :  { %1056 = vmatprep.subr.bf16.mxu1 %v1105_v41 }
 0x171   :  { %1046 = vmatpush3.bf16.msra.mxu0 %v1045_v35 }
 0x172   :  { %1047 = vmatprep.subr.bf16.mxu0 %v1105_v41 }
 0x173   :  { %1058 = vmatpush3.bf16.msra.mxu1 %v1057_v38 }
 0x174   :  { %1059 = vmatprep.subr.bf16.mxu1 %v1105_v41 }
 0x175   :  { %1049 = vmatpush3.bf16.msra.mxu0 %v1048_v42 }
 0x176   :  { %1050 = vmatprep.subr.bf16.mxu0 %v1105_v41 }
 0x177   :  { %1061 = vmatpush3.bf16.msra.mxu1 %v1060_v45 }
 0x178   :  { %1062 = vmatprep.subr.bf16.mxu1 %v1105_v41 }
 0x179   :  { %1052 = vmatpush3.bf16.msra.mxu0 %v1051_v49 }
 0x17a   :  { %1065 = vmatprep.subr.bf16.mxu0 %v1105_v41 }
 0x17b   :  { %1064 = vmatpush3.bf16.msra.mxu1 %v1063_v50 }
 0x17c   :  { %965 = vmatmul.mubr.msk.f32.vlgmr.msra.gmra.mrb[4].mxu0 %vm432_vm6, %v397_v51 }
 0x17d   :  { %994 = vmatprep.mubr.msk.f32.mxu0 %vm1106_vm5, %v1103_v9  ;;  %1067 = vmatpush3.bf16.msra.mxu0 %v1066_v55  ;;  %v745_v9 = vld [vmem:[%s1370_s3 + $0x18] sm:$0xff] }
 0x17e   :  { %984 = vmatmul.mubr.msk.f32.vlgmr.msra.gmra.mrb[4].mxu1 %vm432_vm6, %v399_v52  ;;  %1068 = vmatprep.subr.bf16.mxu0 %v1105_v41  ;;  %v1069_v57 = vpack.c.bf16 %v745_v9, %v744_v56 }
 0x181   :  { %1070 = vmatpush3.bf16.msra.mxu0 %v1069_v57 }
 0x23f   :  { %v502_v58 = vpop.f32.mrb[2].mxu0 }
 0x240   :  { %v928_v59 = vpop.f32.mrb[3].mxu0  ;;  %v726_v61 = vsel %vm725_vm7, %v502_v58, 0.0 }
 0x241   :  { %v575_v60 = vpop.f32.mrb[2].mxu1 }
 0x242   :  { %v727_v62 = vsel %vm725_vm7, %v575_v60, 0.0  ;;  %v947_v63 = vpop.f32.mrb[3].mxu1 }
 0x243   :  { %v728_v0 = vadd.f32 %v727_v62, %v726_v61 }
 0x24f   :  { %v648_v1 = vpop.f32.mrb[4].mxu0 }
 0x250   :  { %v729_v41 = vsel %vm725_vm7, %v648_v1, 0.0  ;;  %v966_v2 = vpop.f32.mrb[5].mxu0 }
 0x251   :  { %v730_v3 = vadd.f32 %v729_v41, %v728_v0  ;;  %v721_v4 = vpop.f32.mrb[4].mxu1 }
 0x252   :  { %v731_v5 = vsel %vm725_vm7, %v721_v4, 0.0  ;;  %v985_v7 = vpop.f32.mrb[5].mxu1 }
 0x253   :  { %v732_v8 = vadd.f32 %v731_v5, %v730_v3 }
 0x255   :  { %v740_v10 = vadd.f32 %v866_v6, %v732_v8 }
 0x257   :  { %v741_v11 = vmax.f32 %v740_v10, 0.0 }
 0x259   :  { %995 = vmatmul.mubr.msk.f32.vlgmr.msra.gmra.mrb[6].mxu0 %vm751_vm8, %v741_v11 }
 0x32c   :  { %v821_v13 = vpop.f32.mrb[6].mxu0 }
 0x32d   :  { %v822_v14 = vadd.f32 %v867_v12, %v821_v13  ;;  %v996_v16 = vpop.f32.mrb[7].mxu0 }
 0x32f   :  { %826 = vst.msk [vmem:[#allocation7] sm:$0x3] %vm825_vm9, %v822_v14 }
 0x330   :  { %1090 = shalt.err (!%p1087_p4)
}
 0x331   :  { %s1091_s30 = scalar_lea.hbm %s1373_s6, 32 }
 0x332   :  { %p1092_p5 = scmp.ne.s32.totalorder %s1373_s6, %s1091_s30  ;;  %p1095_p6 = scmp.lt.u32.totalorder %s1091_s30, %s1373_s6 }
 0x334   :  { %p1097_p7 = pnand %p1095_p6, %p1092_p5 }
 0x336   :  { %1100 = shalt.err (!%p1097_p7)
}
 0x337   :  { %836 = dma.vmem_to_hbm [thread:$0]  %s834_s28, 32, %s1373_s6, [#allocation8]  }
 0x338   :  { %1101 = dma.done.wait [#allocation8], 32  }
 0x339   :  { %1102 = vsyncadd [#allocation8], 4294967264 }
 0x33a   :  { %840 = vsyncpa [#allocation8], 1 }

</bundles_post_ra>
